<compile_context>
chip_gen: v6e
topology: v6e:2x2x1
jax: 0.10.0
libtpu: 0.0.40
codegen_flags: <defaults>
</compile_context>

<pallas_src>
import functools

import jax
import jax.numpy as jnp
import numpy as np
from jax.experimental import pallas as pl
from jax.experimental.pallas import tpu as pltpu

# MLP dims from the nn.Sequential: 2 -> 64 -> 128 -> 128 -> 64 -> 50 -> 1
DIMS = [2, 64, 128, 128, 64, 50, 1]


def _round_up(x, m):
    return ((x + m - 1) // m) * m


def _cdiv(a, b):
    return (a + b - 1) // b


def _xavier_uniform(key, fan_out, fan_in):
    bound = np.sqrt(6.0 / (fan_in + fan_out))
    # Native PyTorch nn.Linear layout: weight is [out, in].
    return jax.random.uniform(key, (fan_out, fan_in), jnp.float32, -bound, bound)


def init_params(key):
    params = []
    for i in range(len(DIMS) - 1):
        key, sub = jax.random.split(key)
        w = _xavier_uniform(sub, DIMS[i + 1], DIMS[i])   # [out, in]
        b = jnp.zeros((DIMS[i + 1],), jnp.float32)       # nn.init.zeros_
        params.append((w, b))
    return params


def _num_tensorcores():
    """2 on v7x-class chips (2 TCs/chip), else 1. Heuristic; safe fallback."""
    try:
        kind = jax.devices()[0].device_kind.lower()
    except Exception:
        return 1
    if ("v7" in kind) or ("tpu7" in kind):
        return 2
    return 1


def _pick_batch_tile(B, block_b):
    """Lane-dense batch tile: multiple of 128, >=2 tiles on 2-TC chips."""
    lanes = _round_up(max(int(B), 1), 128)
    tb = min(_round_up(int(block_b), 128), lanes)
    nc = _num_tensorcores()
    if nc > 1 and lanes >= nc * 128:
        # Ensure the "parallel" batch axis has at least one tile per core.
        tb = min(tb, _round_up(_cdiv(lanes, nc), 128))
    return tb


def pinn_kernel(x_ref,
                w1c_ref, b1e_ref, w2_ref, b2_ref, w3_ref, b3_ref,
                w4_ref, b4_ref, w5_ref, b5_ref, w6c_ref, b6_ref,
                out_ref, *, mm_dtype, act_dtype):
    # Transposed layout: everything is [features, TB]; x / psi are lane-dense
    # [1, TB] rows so both the input DMA and the output store are unmasked.
    x = x_ref[...]                                        # [1, TB] f32

    # Layer 1 (in=2) on the VPU as an outer-product broadcast:
    #   W1 @ [x; n] + b1  ==  W1[:,0:1] * x + (b1 + n * W1[:,1:2])
    # (the n-dependent part is pre-folded into b1e in the wrapper).
    h = w1c_ref[...] * x + b1e_ref[...]                   # [64, TB] f32
    h = jnp.tanh(h.astype(act_dtype)).astype(mm_dtype)

    def dense_tanh(h, w_ref, b_ref):
        # W [out, in] @ h [in, TB] -> batch maps to the MXU lane/N dimension.
        acc = jnp.dot(w_ref[...], h, preferred_element_type=jnp.float32)
        return jnp.tanh((acc + b_ref[...]).astype(act_dtype)).astype(mm_dtype)

    h = dense_tanh(h, w2_ref, b2_ref)                     # [128, TB]
    h = dense_tanh(h, w3_ref, b3_ref)                     # [128, TB]
    h = dense_tanh(h, w4_ref, b4_ref)                     # [64, TB]
    h = dense_tanh(h, w5_ref, b5_ref)                     # [64, TB] (50 padded to 64)

    # Layer 6 (64 -> 1): multiply in mm_dtype, sublane-reduce with f32
    # accumulation (XLU has slack); emits a lane-dense [1, TB] row directly.
    prod = h * w6c_ref[...]                               # [64, TB]
    psi = jnp.sum(prod, axis=0, keepdims=True, dtype=jnp.float32) + b6_ref[...]
    out_ref[...] = psi.astype(out_ref.dtype)              # [1, TB]


def pinn_forward(params, x, n, maxN, *, block_b=4096,
                 mm_dtype=jnp.bfloat16, act_dtype=jnp.float32):
    """x: [B, 1] float32; n, maxN: scalars. Returns psi: [B, 1] float32.

    mm_dtype: matmul operand dtype (bf16 feeds the MXU at full rate on all TPU
              generations; pass jnp.float32 for a fully f32 chain).
    act_dtype: dtype for bias-add/tanh (f32 default for reproducible numerics;
               jnp.bfloat16 is fine on v6e/v7x which have a bf16 EUP).
    """
    x = jnp.asarray(x, jnp.float32).reshape(-1)           # [B]
    B = x.shape[0]

    tb = _pick_batch_tile(B, block_b)
    B_pad = _round_up(B, tb)
    if B_pad != B:
        x = jnp.pad(x, (0, B_pad - B))
    x_row = x.reshape(1, B_pad)                           # lane-dense input row
    num_tiles = B_pad // tb

    n_scaled = jnp.clip(
        jnp.asarray(n, jnp.float32) / jnp.asarray(maxN, jnp.float32), 0.0, 1.0)

    (w1, b1), (w2, b2), (w3, b3), (w4, b4), (w5, b5), (w6, b6) = params
    w1 = jnp.asarray(w1, jnp.float32); b1 = jnp.asarray(b1, jnp.float32).reshape(-1)
    w2 = jnp.asarray(w2, jnp.float32); b2 = jnp.asarray(b2, jnp.float32).reshape(-1)
    w3 = jnp.asarray(w3, jnp.float32); b3 = jnp.asarray(b3, jnp.float32).reshape(-1)
    w4 = jnp.asarray(w4, jnp.float32); b4 = jnp.asarray(b4, jnp.float32).reshape(-1)
    w5 = jnp.asarray(w5, jnp.float32); b5 = jnp.asarray(b5, jnp.float32).reshape(-1)
    w6 = jnp.asarray(w6, jnp.float32); b6 = jnp.asarray(b6, jnp.float32).reshape(-1)

    # Layer 1: fold the n input into an effective bias column (exact).
    w1c = w1[:, 0:1]                                      # [64, 1] f32
    b1e = b1.reshape(-1, 1) + n_scaled * w1[:, 1:2]       # [64, 1] f32

    # Pad the 50-wide layer to 64 output rows (padded weights/bias exactly 0,
    # so padded activations are tanh(0)=0 and the padded w6 entries are 0).
    pad5 = 64 - w5.shape[0]
    w5p = jnp.pad(w5, ((0, pad5), (0, 0)))                # [64, 64]
    b5p = jnp.pad(b5, (0, pad5)).reshape(-1, 1)           # [64, 1]
    w6c = jnp.pad(w6, ((0, 0), (0, pad5))).T              # [64, 1]
    b6c = b6.reshape(1, 1)                                # [1, 1]

    md = mm_dtype
    flat = [
        w1c, b1e,                                         # layer 1 (VPU, f32)
        w2.astype(md), b2.reshape(-1, 1),
        w3.astype(md), b3.reshape(-1, 1),
        w4.astype(md), b4.reshape(-1, 1),
        w5p.astype(md), b5p,
        w6c.astype(md), b6c,                              # final reduce, f32 acc
    ]

    def resident(p):
        # Constant block index -> weights/biases stay VMEM-resident across the
        # whole batch grid (DMA'd once; total footprint < 200 KiB).
        return pl.BlockSpec(tuple(p.shape), lambda i: (0, 0))

    io_spec = pl.BlockSpec((1, tb), lambda i: (0, i))     # lane-dense x / psi

    grid_spec = pltpu.PrefetchScalarGridSpec(
        num_scalar_prefetch=0,
        grid=(num_tiles,),
        in_specs=[io_spec] + [resident(p) for p in flat],
        out_specs=io_spec,
    )

    out = pl.pallas_call(
        functools.partial(pinn_kernel, mm_dtype=mm_dtype, act_dtype=act_dtype),
        out_shape=jax.ShapeDtypeStruct((1, B_pad), jnp.float32),
        grid_spec=grid_spec,
        compiler_params=pltpu.CompilerParams(
            dimension_semantics=("parallel",),
        ),
    )(x_row, *flat)

    return out[0, :B].reshape(-1, 1)


def pinn_forward_ref(params, x, n, maxN):
    """Pure-JAX reference mirroring the PyTorch forward (f32, highest precision)."""
    n_scaled = jnp.clip(jnp.asarray(n, jnp.float32) / jnp.asarray(maxN, jnp.float32),
                        0.0, 1.0)
    x = jnp.asarray(x, jnp.float32)
    h = jnp.concatenate([x, n_scaled * jnp.ones_like(x)], axis=1)
    for i, (w, b) in enumerate(params):
        h = jnp.dot(h, w.T, precision=jax.lax.Precision.HIGHEST) + b
        if i < len(params) - 1:
            h = jnp.tanh(h)
    return h


if __name__ == "__main__":
    key = jax.random.PRNGKey(0)
    key, pkey, xkey = jax.random.split(key, 3)

    params = init_params(pkey)

    B = 300                      # small, deliberately not a multiple of 128
    x = jax.random.uniform(xkey, (B, 1), jnp.float32, -1.0, 1.0)
    n, maxN = 3.0, 10.0

    psi_ref = pinn_forward_ref(params, x, n, maxN)

    # f32 matmul path, forced multi-tile (tb=128 -> 3 grid steps, padding path).
    psi_f32 = jax.block_until_ready(
        pinn_forward(params, x, n, maxN, block_b=128, mm_dtype=jnp.float32))
    np.testing.assert_allclose(np.asarray(psi_f32), np.asarray(psi_ref),
                               rtol=1e-2, atol=1e-2)

    # Default path: bf16 MXU operands, f32 bias/tanh, single lane-dense tile.
    psi_bf16 = jax.block_until_ready(pinn_forward(params, x, n, maxN))
    np.testing.assert_allclose(np.asarray(psi_bf16), np.asarray(psi_ref),
                               rtol=4e-2, atol=4e-2)

    print("KERNEL_OK")
</pallas_src>

<mosaic_0001>
module attributes {stable_mosaic.version = 11 : i64} {
  func.func @pinn_kernel(%arg0: i32, %arg1: memref<1x128xf32, #tpu.memory_space<vmem>>, %arg2: memref<64x1xf32, #tpu.memory_space<vmem>>, %arg3: memref<64x1xf32, #tpu.memory_space<vmem>>, %arg4: memref<128x64xf32, #tpu.memory_space<vmem>>, %arg5: memref<128x1xf32, #tpu.memory_space<vmem>>, %arg6: memref<128x128xf32, #tpu.memory_space<vmem>>, %arg7: memref<128x1xf32, #tpu.memory_space<vmem>>, %arg8: memref<64x128xf32, #tpu.memory_space<vmem>>, %arg9: memref<64x1xf32, #tpu.memory_space<vmem>>, %arg10: memref<64x64xf32, #tpu.memory_space<vmem>>, %arg11: memref<64x1xf32, #tpu.memory_space<vmem>>, %arg12: memref<64x1xf32, #tpu.memory_space<vmem>>, %arg13: memref<1x1xf32, #tpu.memory_space<vmem>>, %arg14: memref<1x128xf32, #tpu.memory_space<vmem>>) attributes {dimension_semantics = [#tpu.dimension_semantics<parallel>], iteration_bounds = array<i64: 3>, scalar_prefetch = 0 : i64, scratch_operands = 0 : i64, tpu.core_type = #tpu.core_type<tc>, window_params = [{transform_indices = @transform_0, window_bounds = array<i64: 1, 128>}, {pipeline_mode = #tpu.pipeline_mode<synchronous>, transform_indices = @transform_1, window_bounds = array<i64: 64, 1>}, {pipeline_mode = #tpu.pipeline_mode<synchronous>, transform_indices = @transform_2, window_bounds = array<i64: 64, 1>}, {pipeline_mode = #tpu.pipeline_mode<synchronous>, transform_indices = @transform_3, window_bounds = array<i64: 128, 64>}, {pipeline_mode = #tpu.pipeline_mode<synchronous>, transform_indices = @transform_4, window_bounds = array<i64: 128, 1>}, {pipeline_mode = #tpu.pipeline_mode<synchronous>, transform_indices = @transform_5, window_bounds = array<i64: 128, 128>}, {pipeline_mode = #tpu.pipeline_mode<synchronous>, transform_indices = @transform_6, window_bounds = array<i64: 128, 1>}, {pipeline_mode = #tpu.pipeline_mode<synchronous>, transform_indices = @transform_7, window_bounds = array<i64: 64, 128>}, {pipeline_mode = #tpu.pipeline_mode<synchronous>, transform_indices = @transform_8, window_bounds = array<i64: 64, 1>}, {pipeline_mode = #tpu.pipeline_mode<synchronous>, transform_indices = @transform_9, window_bounds = array<i64: 64, 64>}, {pipeline_mode = #tpu.pipeline_mode<synchronous>, transform_indices = @transform_10, window_bounds = array<i64: 64, 1>}, {pipeline_mode = #tpu.pipeline_mode<synchronous>, transform_indices = @transform_11, window_bounds = array<i64: 64, 1>}, {pipeline_mode = #tpu.pipeline_mode<synchronous>, transform_indices = @transform_12, window_bounds = array<i64: 1, 1>}, {transform_indices = @transform_13, window_bounds = array<i64: 1, 128>}]} {
    %c0 = arith.constant 0 : index
    %c0_0 = arith.constant 0 : index
    %0 = vector.load %arg1[%c0, %c0_0] : memref<1x128xf32, #tpu.memory_space<vmem>>, vector<1x128xf32>
    %c0_1 = arith.constant 0 : index
    %c0_2 = arith.constant 0 : index
    %1 = vector.load %arg2[%c0_1, %c0_2] : memref<64x1xf32, #tpu.memory_space<vmem>>, vector<64x1xf32>
    %2 = vector.broadcast %1 : vector<64x1xf32> to vector<64x128xf32>
    %3 = vector.broadcast %0 : vector<1x128xf32> to vector<64x128xf32>
    %4 = arith.mulf %2, %3 : vector<64x128xf32>
    %c0_3 = arith.constant 0 : index
    %c0_4 = arith.constant 0 : index
    %5 = vector.load %arg3[%c0_3, %c0_4] : memref<64x1xf32, #tpu.memory_space<vmem>>, vector<64x1xf32>
    %6 = vector.broadcast %5 : vector<64x1xf32> to vector<64x128xf32>
    %7 = arith.addf %4, %6 : vector<64x128xf32>
    %8 = math.tanh %7 : vector<64x128xf32>
    %c0_5 = arith.constant 0 : index
    %c0_6 = arith.constant 0 : index
    %9 = vector.load %arg4[%c0_5, %c0_6] : memref<128x64xf32, #tpu.memory_space<vmem>>, vector<128x64xf32>
    %cst = arith.constant dense<0.000000e+00> : vector<128x128xf32>
    %10 = tpu.matmul %9, %8, %cst {dimension_numbers = #tpu.dot_dimension_numbers<[1], [0], [0], [1], [0, 0, 1, 1], [], []>} : vector<128x64xf32>, vector<64x128xf32>, vector<128x128xf32> -> vector<128x128xf32>
    %c0_7 = arith.constant 0 : index
    %c0_8 = arith.constant 0 : index
    %11 = vector.load %arg5[%c0_7, %c0_8] : memref<128x1xf32, #tpu.memory_space<vmem>>, vector<128x1xf32>
    %12 = vector.broadcast %11 : vector<128x1xf32> to vector<128x128xf32>
    %13 = arith.addf %10, %12 : vector<128x128xf32>
    %14 = math.tanh %13 : vector<128x128xf32>
    %c0_9 = arith.constant 0 : index
    %c0_10 = arith.constant 0 : index
    %15 = vector.load %arg6[%c0_9, %c0_10] : memref<128x128xf32, #tpu.memory_space<vmem>>, vector<128x128xf32>
    %cst_11 = arith.constant dense<0.000000e+00> : vector<128x128xf32>
    %16 = tpu.matmul %15, %14, %cst_11 {dimension_numbers = #tpu.dot_dimension_numbers<[1], [0], [0], [1], [0, 0, 1, 1], [], []>} : vector<128x128xf32>, vector<128x128xf32>, vector<128x128xf32> -> vector<128x128xf32>
    %c0_12 = arith.constant 0 : index
    %c0_13 = arith.constant 0 : index
    %17 = vector.load %arg7[%c0_12, %c0_13] : memref<128x1xf32, #tpu.memory_space<vmem>>, vector<128x1xf32>
    %18 = vector.broadcast %17 : vector<128x1xf32> to vector<128x128xf32>
    %19 = arith.addf %16, %18 : vector<128x128xf32>
    %20 = math.tanh %19 : vector<128x128xf32>
    %c0_14 = arith.constant 0 : index
    %c0_15 = arith.constant 0 : index
    %21 = vector.load %arg8[%c0_14, %c0_15] : memref<64x128xf32, #tpu.memory_space<vmem>>, vector<64x128xf32>
    %cst_16 = arith.constant dense<0.000000e+00> : vector<64x128xf32>
    %22 = tpu.matmul %21, %20, %cst_16 {dimension_numbers = #tpu.dot_dimension_numbers<[1], [0], [0], [1], [0, 0, 1, 1], [], []>} : vector<64x128xf32>, vector<128x128xf32>, vector<64x128xf32> -> vector<64x128xf32>
    %c0_17 = arith.constant 0 : index
    %c0_18 = arith.constant 0 : index
    %23 = vector.load %arg9[%c0_17, %c0_18] : memref<64x1xf32, #tpu.memory_space<vmem>>, vector<64x1xf32>
    %24 = vector.broadcast %23 : vector<64x1xf32> to vector<64x128xf32>
    %25 = arith.addf %22, %24 : vector<64x128xf32>
    %26 = math.tanh %25 : vector<64x128xf32>
    %c0_19 = arith.constant 0 : index
    %c0_20 = arith.constant 0 : index
    %27 = vector.load %arg10[%c0_19, %c0_20] : memref<64x64xf32, #tpu.memory_space<vmem>>, vector<64x64xf32>
    %cst_21 = arith.constant dense<0.000000e+00> : vector<64x128xf32>
    %28 = tpu.matmul %27, %26, %cst_21 {dimension_numbers = #tpu.dot_dimension_numbers<[1], [0], [0], [1], [0, 0, 1, 1], [], []>} : vector<64x64xf32>, vector<64x128xf32>, vector<64x128xf32> -> vector<64x128xf32>
    %c0_22 = arith.constant 0 : index
    %c0_23 = arith.constant 0 : index
    %29 = vector.load %arg11[%c0_22, %c0_23] : memref<64x1xf32, #tpu.memory_space<vmem>>, vector<64x1xf32>
    %30 = vector.broadcast %29 : vector<64x1xf32> to vector<64x128xf32>
    %31 = arith.addf %28, %30 : vector<64x128xf32>
    %32 = math.tanh %31 : vector<64x128xf32>
    %c0_24 = arith.constant 0 : index
    %c0_25 = arith.constant 0 : index
    %33 = vector.load %arg12[%c0_24, %c0_25] : memref<64x1xf32, #tpu.memory_space<vmem>>, vector<64x1xf32>
    %34 = vector.broadcast %33 : vector<64x1xf32> to vector<64x128xf32>
    %35 = arith.mulf %32, %34 : vector<64x128xf32>
    %cst_26 = arith.constant dense<0.000000e+00> : vector<128xf32>
    %36 = vector.multi_reduction <add>, %35, %cst_26 [0] : vector<64x128xf32> to vector<128xf32>
    %37 = vector.shape_cast %36 : vector<128xf32> to vector<1x128xf32>
    %c0_27 = arith.constant 0 : index
    %c0_28 = arith.constant 0 : index
    %38 = vector.load %arg13[%c0_27, %c0_28] : memref<1x1xf32, #tpu.memory_space<vmem>>, vector<1x1xf32>
    %39 = vector.broadcast %38 : vector<1x1xf32> to vector<1x128xf32>
    %40 = arith.addf %37, %39 : vector<1x128xf32>
    %c0_29 = arith.constant 0 : index
    %c0_30 = arith.constant 0 : index
    %41 = vector.load %arg14[%c0_29, %c0_30] : memref<1x128xf32, #tpu.memory_space<vmem>>, vector<1x128xf32>
    tpu.vector_store %arg14[%c0_29, %c0_30], %40 {strides = array<i32>} : memref<1x128xf32, #tpu.memory_space<vmem>>, vector<1x128xf32>,
    return
  }
  func.func @transform_0(%arg0: i32) -> (i32, i32) {
    %c0_i32 = arith.constant 0 : i32
    %c0_i32_0 = arith.constant 0 : i32
    return %c0_i32, %arg0 : i32, i32
  }
  func.func @transform_1(%arg0: i32) -> (i32, i32) {
    %c0_i32 = arith.constant 0 : i32
    %c0_i32_0 = arith.constant 0 : i32
    %c0_i32_1 = arith.constant 0 : i32
    return %c0_i32, %c0_i32_0 : i32, i32
  }
  func.func @transform_2(%arg0: i32) -> (i32, i32) {
    %c0_i32 = arith.constant 0 : i32
    %c0_i32_0 = arith.constant 0 : i32
    %c0_i32_1 = arith.constant 0 : i32
    return %c0_i32, %c0_i32_0 : i32, i32
  }
  func.func @transform_3(%arg0: i32) -> (i32, i32) {
    %c0_i32 = arith.constant 0 : i32
    %c0_i32_0 = arith.constant 0 : i32
    %c0_i32_1 = arith.constant 0 : i32
    return %c0_i32, %c0_i32_0 : i32, i32
  }
  func.func @transform_4(%arg0: i32) -> (i32, i32) {
    %c0_i32 = arith.constant 0 : i32
    %c0_i32_0 = arith.constant 0 : i32
    %c0_i32_1 = arith.constant 0 : i32
    return %c0_i32, %c0_i32_0 : i32, i32
  }
  func.func @transform_5(%arg0: i32) -> (i32, i32) {
    %c0_i32 = arith.constant 0 : i32
    %c0_i32_0 = arith.constant 0 : i32
    %c0_i32_1 = arith.constant 0 : i32
    return %c0_i32, %c0_i32_0 : i32, i32
  }
  func.func @transform_6(%arg0: i32) -> (i32, i32) {
    %c0_i32 = arith.constant 0 : i32
    %c0_i32_0 = arith.constant 0 : i32
    %c0_i32_1 = arith.constant 0 : i32
    return %c0_i32, %c0_i32_0 : i32, i32
  }
  func.func @transform_7(%arg0: i32) -> (i32, i32) {
    %c0_i32 = arith.constant 0 : i32
    %c0_i32_0 = arith.constant 0 : i32
    %c0_i32_1 = arith.constant 0 : i32
    return %c0_i32, %c0_i32_0 : i32, i32
  }
  func.func @transform_8(%arg0: i32) -> (i32, i32) {
    %c0_i32 = arith.constant 0 : i32
    %c0_i32_0 = arith.constant 0 : i32
    %c0_i32_1 = arith.constant 0 : i32
    return %c0_i32, %c0_i32_0 : i32, i32
  }
  func.func @transform_9(%arg0: i32) -> (i32, i32) {
    %c0_i32 = arith.constant 0 : i32
    %c0_i32_0 = arith.constant 0 : i32
    %c0_i32_1 = arith.constant 0 : i32
    return %c0_i32, %c0_i32_0 : i32, i32
  }
  func.func @transform_10(%arg0: i32) -> (i32, i32) {
    %c0_i32 = arith.constant 0 : i32
    %c0_i32_0 = arith.constant 0 : i32
    %c0_i32_1 = arith.constant 0 : i32
    return %c0_i32, %c0_i32_0 : i32, i32
  }
  func.func @transform_11(%arg0: i32) -> (i32, i32) {
    %c0_i32 = arith.constant 0 : i32
    %c0_i32_0 = arith.constant 0 : i32
    %c0_i32_1 = arith.constant 0 : i32
    return %c0_i32, %c0_i32_0 : i32, i32
  }
  func.func @transform_12(%arg0: i32) -> (i32, i32) {
    %c0_i32 = arith.constant 0 : i32
    %c0_i32_0 = arith.constant 0 : i32
    %c0_i32_1 = arith.constant 0 : i32
    return %c0_i32, %c0_i32_0 : i32, i32
  }
  func.func @transform_13(%arg0: i32) -> (i32, i32) {
    %c0_i32 = arith.constant 0 : i32
    %c0_i32_0 = arith.constant 0 : i32
    return %c0_i32, %arg0 : i32, i32
  }
}

</mosaic_0001>

<bundles_post_ra>
// kernel: tpu_custom_call.1
= control target key start
LH: loop header
LB: loop body
LE: loop exit
PB: predicated region body
PF: predicated region fallthrough
CT: control target
= control target key end

     0   :  { %s2756_s0 = inlined_call_operand.vmem [shape: f32[1,384], index: 0, kind: input, shape index: {}]   ;;  %s2757_s1 = inlined_call_operand.vmem [shape: f32[64,1], index: 1, kind: input, shape index: {}]   ;;  %s2758_s2 = inlined_call_operand.vmem [shape: f32[64,1], index: 2, kind: input, shape index: {}]   ;;  %s2759_s3 = inlined_call_operand.vmem [shape: f32[128,64], index: 3, kind: input, shape index: {}]   ;;  %s2760_s4 = inlined_call_operand.vmem [shape: f32[128,1], index: 4, kind: input, shape index: {}]   ;;  %s2761_s5 = inlined_call_operand.vmem [shape: f32[128,128], index: 5, kind: input, shape index: {}]   ;;  %s2762_s6 = inlined_call_operand.vmem [shape: f32[128,1], index: 6, kind: input, shape index: {}]   ;;  %s2763_s7 = inlined_call_operand.vmem [shape: f32[64,128], index: 7, kind: input, shape index: {}]   ;;  %s2764_s8 = inlined_call_operand.vmem [shape: f32[64,1], index: 8, kind: input, shape index: {}]   ;;  %s2765_s9 = inlined_call_operand.vmem [shape: f32[64,64], index: 9, kind: input, shape index: {}]   ;;  %s2766_s10 = inlined_call_operand.vmem [shape: f32[64,1], index: 10, kind: input, shape index: {}]   ;;  %s2767_s11 = inlined_call_operand.vmem [shape: f32[64,1], index: 11, kind: input, shape index: {}]   ;;  %s2768_s12 = inlined_call_operand.<no memory space> [shape: f32[1,1], index: 12, kind: input, shape index: {}]   ;;  %s2769_s13 = inlined_call_operand.hbm [shape: f32[1,384], index: 13, kind: output, shape index: {}]  }
   0x1   :  { %2770 = sst [smem:[#allocation7_spill]] %s2757_s1  ;;  %v18_v0 = vstv %s2768_s12 }
   0x2   :  { %2771 = sst [smem:[#allocation8_spill]] %s2758_s2  ;;  %19 = vst [vmem:[#allocation2] sm:$0x1] %v18_v0 }
   0x3   :  { %20 = vsyncpa [#allocation4], 0 }
   0x4   :  { %22 = vsyncpa [#allocation4 + $0x1], 0  ;;  %s2267_s27 = smov 0   ;;  %s2269_s28 = smov 0  }
   0x5   :  { %s2271_s29 = smov 0   ;;  %s2273_s30 = smov 0  }
   0x6 LB: > { %s2288_s12 = sadd.s32 4294967295, %s2190_s30   ;;  %s1664_s14 = sadd.s32 4294967294, %s2190_s30   ;;  %s2190_s30 = sphi %s2273_s30, %s2781_s30   ;;  %s2186_s29 = sphi %s2271_s29, %s2780_s29   ;;  %s2182_s28 = sphi %s2269_s28, %s2779_s28   ;;  %s2178_s27 = sphi %s2267_s27, %s2778_s27  }
   0x7   : > { %s2292_s15 = sadd.s32 1, %s2190_s30   ;;  %s313_s16 = sadd.s32 1, %s2186_s29 }
   0x8   : > { %s310_s17 = ssub.s32 %s2190_s30, %s2292_s15  ;;  %p323_p0 = scmp.ne.s32.totalorder %s2186_s29, %s2182_s28 }
   0x9   : > { %p311_p1 = scmp.eq.s32.totalorder %s310_s17, 0  ;;  %p324_p2 = scmp.eq.s32.totalorder %s2288_s12, 2 }
   0xa   : > { %p329_p3 = scmp.ne.s32.totalorder %s2182_s28, %s2178_s27  ;;  %p330_p4 = scmp.eq.s32.totalorder %s1664_s14, 2 }
   0xb   : > { %s2303_s18 = scalar_select %p311_p1, %s2186_s29, %s313_s16  }
   0xc   : > { %p2305_p5 = por %p324_p2, %p323_p0  ;;  %p2309_p6 = por %p330_p4, %p329_p3 }
   0xd   : > { %2772 = sst [smem:[#allocation6_spill]] %s2303_s18  ;;  %p1667_p7 = scmp.ge.s32.totalorder %s2190_s30, 1 }
   0xe   : > { %p390_p8 = scmp.lt.s32.totalorder %s2190_s30, 4 }
  0x10   : > { %p391_p9 = pnand %p1667_p7, %p390_p8 }
  0x11   : > { %s2775_s2 = sld [smem:[#allocation8_spill]] (!%p391_p9)  ;;  %p431_p10 = scmp.lt.s32.totalorder (!%p391_p9), %s2288_s12, 2 }
  0x12   : > { %394 = sbr.rel (%p391_p9) target bundleno = 1228 (0x4cc), region = 72  ;;  %s2776_s1 = sld [smem:[#allocation7_spill]] (!%p391_p9) }
  0x13   : > { %s2193_s23 = smov (!%p391_p9), [#allocation3]  }
  0x14   : > { %s2134_s24 = sshll.u32 (!%p391_p9), %s2193_s23, 4  ;;  %s2135_s24 = int_to_ptr.vmem [resolvable:$false] %s2134_s24 }
  0x17   : > { %v504_v1 = vld [vmem:[%s2775_s2 + $0x38] sm:$0xff]  ;;  %v2192_v3 = vmov 0   ;;  %v503_v6 = vld [vmem:[%s2775_s2 + $0x30] sm:$0xff]  ;;  %v502_v8 = vld [vmem:[%s2775_s2 + $0x28] sm:$0xff]  ;;  %vm673_vm0 = vcmask 523264   ;;  %s432_s18 = scalar_select %p431_p10, %s2288_s12, 2 }
  0x18   : > { %v442_v2 = vld [vmem:[%s2776_s1 + $0x38] sm:$0xff]  ;;  %2017 = vset.pattern.permute.xlu1 %v2192_v3  ;;  %2016 = vset.pattern.permute.xlu0 %v2192_v3  ;;  %v441_v4 = vld [vmem:[%s2776_s1 + $0x30] sm:$0xff]  ;;  %v440_v5 = vld [vmem:[%s2776_s1 + $0x28] sm:$0xff] }
  0x19   : > { %542 = vperm.xlu1 %2017, %v504_v1   ;;  %480 = vperm.xlu0 %2016, %v442_v2   ;;  %v439_v7 = vld [vmem:[%s2776_s1 + $0x20] sm:$0xff]  ;;  %v438_v9 = vld [vmem:[%s2776_s1 + $0x18] sm:$0xff]  ;;  %v437_v11 = vld [vmem:[%s2776_s1 + $0x10] sm:$0xff]  ;;  %s433_s17 = scalar_lea.vmem %s2756_s0, %s432_s18  ;;  %s1693_s18 = sshll.u32 %s2288_s12, 4 }
  0x1a   : > { %v501_v10 = vld [vmem:[%s2775_s2 + $0x20] sm:$0xff]  ;;  %v500_v12 = vld [vmem:[%s2775_s2 + $0x18] sm:$0xff]  ;;  %v436_v13 = vld [vmem:[%s2776_s1 + $0x8] sm:$0xff]  ;;  %s2136_s12 = scalar_lea.vmem %s2135_s24, 32 }
  0x1b   : > { %v499_v14 = vld [vmem:[%s2775_s2 + $0x10] sm:$0xff]  ;;  %v435_v15 = vld [vmem:[%s2776_s1] sm:$0xff]  ;;  %v498_v16 = vld [vmem:[%s2775_s2 + $0x8] sm:$0xff]  ;;  %s429_s1 = sand.u32 1, %s2182_s28  }
  0x1c   : > { %v497_v17 = vld [vmem:[%s2775_s2] sm:$0xff]  ;;  %v592_v18 = vld [vmem:[%s2760_s4 + $0x78] sm:$0xff]  ;;  %v591_v19 = vld [vmem:[%s2760_s4 + $0x70] sm:$0xff]  ;;  %s430_s2 = scalar_lea.vmem [#allocation3], %s429_s1  ;;  %s1600_s21 = scalar_lea.sflag [#allocation4], %s429_s1 }
  0x1d   : > { %475 = vperm.xlu0 %2016, %v441_v4   ;;  %470 = vperm.xlu1 %2017, %v440_v5   ;;  %v590_v20 = vld [vmem:[%s2760_s4 + $0x68] sm:$0xff]  ;;  %v589_v21 = vld [vmem:[%s2760_s4 + $0x60] sm:$0xff]  ;;  %v588_v22 = vld [vmem:[%s2760_s4 + $0x58] sm:$0xff]  ;;  %s1612_s26 = sshll.u32 %s430_s2, 4  ;;  %s1613_s26 = int_to_ptr.vmem [resolvable:$true] %s1612_s26 }
  0x1e   : > { %v587_v23 = vld [vmem:[%s2760_s4 + $0x50] sm:$0xff]  ;;  %v586_v24 = vld [vmem:[%s2760_s4 + $0x48] sm:$0xff]  ;;  %v585_v25 = vld [vmem:[%s2760_s4 + $0x40] sm:$0xff]  ;;  %s2130_s22 = scalar_lea.vmem %s1613_s26, 16  ;;  %p2137_p0 = scmp.lt.s32.totalorder %s1613_s26, %s2135_s24 }
  0x1f   : > { %v561_v26 = vld [vmem:[%s2759_s3] sm:$0xff]  ;;  %v584_v27 = vld [vmem:[%s2760_s4 + $0x38] sm:$0xff]  ;;  %v583_v28 = vld [vmem:[%s2760_s4 + $0x30] sm:$0xff]  ;;  %p2131_p11 = scmp.ne.s32.totalorder %s1613_s26, %s2130_s22  ;;  %p2138_p1 = scmp.lt.s32.totalorder %s2136_s12, %s2130_s22 }
  0x20   : > { %1808 = vmatprep.mubr.msk.f32.mxu0 %vm673_vm0, %v561_v26  ;;  %v582_v29 = vld [vmem:[%s2760_s4 + $0x28] sm:$0xff]  ;;  %v581_v30 = vld [vmem:[%s2760_s4 + $0x20] sm:$0xff]  ;;  %v580_v31 = vld [vmem:[%s2760_s4 + $0x18] sm:$0xff] }
  0x21   : > { %537 = vperm.xlu0 %2016, %v503_v6   ;;  %465 = vperm.xlu1 %2017, %v439_v7   ;;  %v579_v32 = vld [vmem:[%s2760_s4 + $0x10] sm:$0xff]  ;;  %v578_v33 = vld [vmem:[%s2760_s4 + $0x8] sm:$0xff]  ;;  %v577_v34 = vld [vmem:[%s2760_s4] sm:$0xff]  ;;  %p2132_p12 = pnand %p2131_p11, %p2305_p5  ;;  %p2139_p2 = por %p2138_p1, %p2137_p0 }
  0x22   : > { %v914_v35 = vld [vmem:[%s2762_s6 + $0x78] sm:$0xff]  ;;  %v913_v36 = vld [vmem:[%s2762_s6 + $0x70] sm:$0xff]  ;;  %v912_v37 = vld [vmem:[%s2762_s6 + $0x68] sm:$0xff] }
  0x23   : > { %v911_v38 = vld [vmem:[%s2762_s6 + $0x60] sm:$0xff]  ;;  %v910_v39 = vld [vmem:[%s2762_s6 + $0x58] sm:$0xff]  ;;  %v909_v40 = vld [vmem:[%s2762_s6 + $0x50] sm:$0xff]  ;;  %p2133_p13 = pneg %p2132_p12 }
  0x24   : > { %v908_v41 = vld [vmem:[%s2762_s6 + $0x48] sm:$0xff]  ;;  %v907_v42 = vld [vmem:[%s2762_s6 + $0x40] sm:$0xff]  ;;  %v906_v43 = vld [vmem:[%s2762_s6 + $0x38] sm:$0xff] }
  0x25   : > { %532 = vperm.xlu0 %2016, %v502_v8   ;;  %460 = vperm.xlu1 %2017, %v438_v9   ;;  %v905_v44 = vld [vmem:[%s2762_s6 + $0x30] sm:$0xff]  ;;  %v904_v45 = vld [vmem:[%s2762_s6 + $0x28] sm:$0xff]  ;;  %v903_v46 = vld [vmem:[%s2762_s6 + $0x20] sm:$0xff]  ;;  %p2140_p3 = pnand %p2139_p2, %p2133_p13 }
  0x26   : > { %v902_v47 = vld [vmem:[%s2762_s6 + $0x18] sm:$0xff]  ;;  %v901_v48 = vld [vmem:[%s2762_s6 + $0x10] sm:$0xff]  ;;  %v900_v49 = vld [vmem:[%s2762_s6 + $0x8] sm:$0xff] }
  0x27   : > { %v899_v50 = vld [vmem:[%s2762_s6] sm:$0xff]  ;;  %v1171_v51 = vld [vmem:[%s2764_s8 + $0x38] sm:$0xff]  ;;  %v1170_v52 = vld [vmem:[%s2764_s8 + $0x30] sm:$0xff] }
  0x28   : > { %v1169_v53 = vld [vmem:[%s2764_s8 + $0x28] sm:$0xff]  ;;  %v1168_v54 = vld [vmem:[%s2764_s8 + $0x20] sm:$0xff]  ;;  %v1167_v55 = vld [vmem:[%s2764_s8 + $0x18] sm:$0xff] }
  0x29   : > { %527 = vperm.xlu0 %2016, %v501_v10   ;;  %455 = vperm.xlu1 %2017, %v437_v11   ;;  %v1166_v56 = vld [vmem:[%s2764_s8 + $0x10] sm:$0xff]  ;;  %v1165_v57 = vld [vmem:[%s2764_s8 + $0x8] sm:$0xff]  ;;  %v1164_v58 = vld [vmem:[%s2764_s8] sm:$0xff] }
  0x2a   : > { %v1333_v59 = vld [vmem:[%s2766_s10] sm:$0xff]  ;;  %v1334_v60 = vld [vmem:[%s2766_s10 + $0x8] sm:$0xff]  ;;  %v1335_v61 = vld [vmem:[%s2766_s10 + $0x10] sm:$0xff] }
  0x2b   : > { %v1336_v62 = vld [vmem:[%s2766_s10 + $0x18] sm:$0xff]  ;;  %v1337_v63 = vld [vmem:[%s2766_s10 + $0x20] sm:$0xff]  ;;  %v1338_v0 = vld [vmem:[%s2766_s10 + $0x28] sm:$0xff] }
  0x2c   : > { %v1668_v1 = vld [vmem:[%s433_s17] ss:$0 sm:$0xff]  ;;  %v1339_v2 = vld [vmem:[%s2766_s10 + $0x30] sm:$0xff]  ;;  %v1340_v3 = vld [vmem:[%s2766_s10 + $0x38] sm:$0xff]  ;;  %s1610_s17 = scalar_lea.hbm %s2769_s13, %s1693_s18 }
  0x2d   : > { %522 = vperm.xlu0 %2016, %v500_v12   ;;  %450 = vperm.xlu1 %2017, %v436_v13   ;;  %v1518_v7 = vld [vmem:[%s2767_s11] sm:$0xff]  ;;  %v1519_v8 = vld [vmem:[%s2767_s11 + $0x8] sm:$0xff]  ;;  %v1520_v12 = vld [vmem:[%s2767_s11 + $0x10] sm:$0xff] }
  0x2e   : > { %v1521_v13 = vld [vmem:[%s2767_s11 + $0x18] sm:$0xff] }
  0x31   : > { %517 = vperm.xlu0 %2016, %v499_v14   ;;  %445 = vperm.xlu1 %2017, %v435_v15  }
  0x35   : > { %512 = vperm.xlu0 %2016, %v498_v16   ;;  %507 = vperm.xlu1 %2017, %v497_v17  }
  0x39   : > { %670 = vperm.xlu0 %2016, %v592_v18   ;;  %665 = vperm.xlu1 %2017, %v591_v19   ;;  %v1522_v18 = vld [vmem:[%s2767_s11 + $0x20] sm:$0xff]  ;;  %v1523_v19 = vld [vmem:[%s2767_s11 + $0x28] sm:$0xff] }
  0x3d   : > { %660 = vperm.xlu0 %2016, %v590_v20   ;;  %655 = vperm.xlu1 %2017, %v589_v21  }
  0x41   : > { %650 = vperm.xlu0 %2016, %v588_v22   ;;  %645 = vperm.xlu1 %2017, %v587_v23  }
  0x45   : > { %640 = vperm.xlu0 %2016, %v586_v24   ;;  %635 = vperm.xlu1 %2017, %v585_v25   ;;  %v1524_v24 = vld [vmem:[%s2767_s11 + $0x30] sm:$0xff]  ;;  %v1525_v25 = vld [vmem:[%s2767_s11 + $0x38] sm:$0xff] }
  0x49   : > { %630 = vperm.xlu0 %2016, %v584_v27   ;;  %625 = vperm.xlu1 %2017, %v583_v28  }
  0x4d   : > { %620 = vperm.xlu0 %2016, %v582_v29   ;;  %615 = vperm.xlu1 %2017, %v581_v30  }
  0x51   : > { %610 = vperm.xlu0 %2016, %v580_v31   ;;  %605 = vperm.xlu1 %2017, %v579_v32   ;;  %v1587_v31 = vld [vmem:[#allocation2] sm:$0x1] }
  0x55   : > { %600 = vperm.xlu0 %2016, %v578_v33   ;;  %595 = vperm.xlu1 %2017, %v577_v34  }
  0x59   : > { %992 = vperm.xlu0 %2016, %v914_v35   ;;  %987 = vperm.xlu1 %2017, %v913_v36  }
  0x5d   : > { %982 = vperm.xlu0 %2016, %v912_v37   ;;  %977 = vperm.xlu1 %2017, %v911_v38  }
  0x61   : > { %972 = vperm.xlu0 %2016, %v910_v39   ;;  %967 = vperm.xlu1 %2017, %v909_v40  }
  0x65   : > { %962 = vperm.xlu0 %2016, %v908_v41   ;;  %957 = vperm.xlu1 %2017, %v907_v42  }
  0x69   : > { %952 = vperm.xlu0 %2016, %v906_v43   ;;  %947 = vperm.xlu1 %2017, %v905_v44  }
  0x6d   : > { %942 = vperm.xlu0 %2016, %v904_v45   ;;  %937 = vperm.xlu1 %2017, %v903_v46  }
  0x71   : > { %932 = vperm.xlu0 %2016, %v902_v47   ;;  %927 = vperm.xlu1 %2017, %v901_v48  }
  0x75   : > { %922 = vperm.xlu0 %2016, %v900_v49   ;;  %917 = vperm.xlu1 %2017, %v899_v50  }
  0x79   : > { %1209 = vperm.xlu0 %2016, %v1171_v51   ;;  %1204 = vperm.xlu1 %2017, %v1170_v52  }
  0x7d   : > { %1199 = vperm.xlu0 %2016, %v1169_v53   ;;  %1194 = vperm.xlu1 %2017, %v1168_v54   ;;  %v562_v53 = vld [vmem:[%s2759_s3 + $0x8] sm:$0xff]  ;;  %v563_v54 = vld [vmem:[%s2759_s3 + $0x10] sm:$0xff] }
  0x81   : > { %1189 = vperm.xlu0 %2016, %v1167_v55   ;;  %1184 = vperm.xlu1 %2017, %v1166_v56   ;;  %v564_v55 = vld [vmem:[%s2759_s3 + $0x18] sm:$0xff]  ;;  %v565_v56 = vld [vmem:[%s2759_s3 + $0x20] sm:$0xff] }
  0x85   : > { %1179 = vperm.xlu0 %2016, %v1165_v57   ;;  %1174 = vperm.xlu1 %2017, %v1164_v58   ;;  %v566_v57 = vld [vmem:[%s2759_s3 + $0x28] sm:$0xff]  ;;  %v567_v58 = vld [vmem:[%s2759_s3 + $0x30] sm:$0xff] }
  0x89   : > { %1343 = vperm.xlu0 %2016, %v1333_v59   ;;  %1348 = vperm.xlu1 %2017, %v1334_v60   ;;  %v568_v59 = vld [vmem:[%s2759_s3 + $0x38] sm:$0xff]  ;;  %v569_v60 = vld [vmem:[%s2759_s3 + $0x40] sm:$0xff] }
  0x8d   : > { %1353 = vperm.xlu0 %2016, %v1335_v61   ;;  %1358 = vperm.xlu1 %2017, %v1336_v62   ;;  %v570_v61 = vld [vmem:[%s2759_s3 + $0x48] sm:$0xff]  ;;  %v571_v62 = vld [vmem:[%s2759_s3 + $0x50] sm:$0xff] }
  0x91   : > { %1363 = vperm.xlu0 %2016, %v1337_v63   ;;  %1368 = vperm.xlu1 %2017, %v1338_v0   ;;  %v572_v63 = vld [vmem:[%s2759_s3 + $0x58] sm:$0xff]  ;;  %v573_v0 = vld [vmem:[%s2759_s3 + $0x60] sm:$0xff] }
  0x94   : > { %v543_v4 = vpop.permute.xlu1 %542  ;;  %v481_v5 = vpop.permute.xlu0 %480 }
  0x95   : > { %v496_v6 = vmul.f32 %v1668_v1, %v481_v5  ;;  %1373 = vperm.xlu0 %2016, %v1339_v2   ;;  %1378 = vperm.xlu1 %2017, %v1340_v3   ;;  %v575_v2 = vld [vmem:[%s2759_s3 + $0x70] sm:$0xff]  ;;  %v576_v3 = vld [vmem:[%s2759_s3 + $0x78] sm:$0xff] }
  0x97   : > { %v552_v9 = vadd.f32 %v543_v4, %v496_v6  ;;  %v883_v4 = vld [vmem:[%s2761_s5] sm:$0xff] }
  0x98   : > { %v476_v10 = vpop.permute.xlu0 %475  ;;  %v471_v11 = vpop.permute.xlu1 %470  ;;  %1864 = vmatprep.mubr.f32.mxu1 %v883_v4 }
  0x99   : > { %2018 = vtanh.f32 %v552_v9  ;;  %1528 = vperm.xlu0 %2016, %v1518_v7   ;;  %1533 = vperm.xlu1 %2017, %v1519_v8   ;;  %v495_v14 = vmul.f32 %v1668_v1, %v476_v10  ;;  %v494_v20 = vmul.f32 %v1668_v1, %v471_v11 }
  0x9c   : > { %v538_v15 = vpop.permute.xlu0 %537  ;;  %v466_v16 = vpop.permute.xlu1 %465 }
  0x9d   : > { %v551_v17 = vadd.f32 %v538_v15, %v495_v14  ;;  %1538 = vperm.xlu0 %2016, %v1520_v12   ;;  %1543 = vperm.xlu1 %2017, %v1521_v13   ;;  %v493_v26 = vmul.f32 %v1668_v1, %v466_v16 }
  0x9f   : > { %2020 = vtanh.f32 %v551_v17 }
  0xa0   : > { %v533_v21 = vpop.permute.xlu0 %532  ;;  %v461_v22 = vpop.permute.xlu1 %460 }
  0xa1   : > { %v550_v23 = vadd.f32 %v533_v21, %v494_v20  ;;  %1548 = vperm.xlu0 %2016, %v1522_v18   ;;  %1553 = vperm.xlu1 %2017, %v1523_v19   ;;  %v492_v32 = vmul.f32 %v1668_v1, %v461_v22 }
  0xa3   : > { %2022 = vtanh.f32 %v550_v23 }
  0xa4   : > { %v528_v27 = vpop.permute.xlu0 %527  ;;  %v456_v28 = vpop.permute.xlu1 %455 }
  0xa5   : > { %v549_v29 = vadd.f32 %v528_v27, %v493_v26  ;;  %1558 = vperm.xlu0 %2016, %v1524_v24   ;;  %1563 = vperm.xlu1 %2017, %v1525_v25   ;;  %v491_v36 = vmul.f32 %v1668_v1, %v456_v28 }
  0xa6   : > { %v2019_v30 = vpop.eup %2018 }
  0xa7   : > { %2024 = vtanh.f32 %v549_v29  ;;  %1792 = vmatprep.subr.mxu0 %v2019_v30 }
  0xa8   : > { %v523_v33 = vpop.permute.xlu0 %522  ;;  %v451_v34 = vpop.permute.xlu1 %450  ;;  %1793 = vmatpush3.msra.mxu0 %v2019_v30 }
  0xa9   : > { %v548_v35 = vadd.f32 %v523_v33, %v492_v32  ;;  %1590 = vperm.xlu0 %2016, %v1587_v31   ;;  %v490_v41 = vmul.f32 %v1668_v1, %v451_v34 }
  0xab   : > { %2026 = vtanh.f32 %v548_v35 }
  0xac   : > { %v2021_v37 = vpop.eup %2020  ;;  %v518_v38 = vpop.permute.xlu0 %517 }
  0xad   : > { %v446_v39 = vpop.permute.xlu1 %445  ;;  %v547_v40 = vadd.f32 %v518_v38, %v491_v36  ;;  %1794 = vmatprep.subr.mxu0 %v2021_v37 }
  0xae   : > { %1795 = vmatpush3.msra.mxu0 %v2021_v37  ;;  %v489_v42 = vmul.f32 %v1668_v1, %v446_v39  ;;  %v574_v1 = vld [vmem:[%s2759_s3 + $0x68] sm:$0xff] }
  0xaf   : > { %2028 = vtanh.f32 %v547_v40 }
  0xb0   : > { %v2023_v43 = vpop.eup %2022  ;;  %v513_v44 = vpop.permute.xlu0 %512 }
  0xb1   : > { %v508_v45 = vpop.permute.xlu1 %507  ;;  %v546_v46 = vadd.f32 %v513_v44, %v490_v41  ;;  %1796 = vmatprep.subr.mxu0 %v2023_v43 }
  0xb2   : > { %v545_v47 = vadd.f32 %v508_v45, %v489_v42  ;;  %1797 = vmatpush3.msra.mxu0 %v2023_v43 }
  0xb3   : > { %2030 = vtanh.f32 %v546_v46 }
  0xb4   : > { %v2025_v48 = vpop.eup %2024  ;;  %2032 = vtanh.f32 %v545_v47  ;;  %v671_v11 = vpop.permute.xlu0 %670 }
  0xb5   : > { %1798 = vmatprep.subr.mxu0 %v2025_v48  ;;  %v666_v13 = vpop.permute.xlu1 %665 }
  0xb6   : > { %1799 = vmatpush3.msra.mxu0 %v2025_v48 }
  0xb8   : > { %v2027_v49 = vpop.eup %2026  ;;  %v661_v16 = vpop.permute.xlu0 %660 }
  0xb9   : > { %1800 = vmatprep.subr.mxu0 %v2027_v49  ;;  %v656_v18 = vpop.permute.xlu1 %655 }
  0xba   : > { %1801 = vmatpush3.msra.mxu0 %v2027_v49 }
  0xbc   : > { %v2029_v50 = vpop.eup %2028  ;;  %v651_v21 = vpop.permute.xlu0 %650 }
  0xbd   : > { %1802 = vmatprep.subr.mxu0 %v2029_v50  ;;  %v646_v23 = vpop.permute.xlu1 %645 }
  0xbe   : > { %1803 = vmatpush3.msra.mxu0 %v2029_v50 }
  0xc0   : > { %v2031_v51 = vpop.eup %2030  ;;  %v641_v27 = vpop.permute.xlu0 %640 }
  0xc1   : > { %1804 = vmatprep.subr.mxu0 %v2031_v51  ;;  %v2033_v52 = vpop.eup %2032  ;;  %v636_v31 = vpop.permute.xlu1 %635 }
  0xc2   : > { %1805 = vmatpush3.msra.mxu0 %v2031_v51 }
  0xc3   : > { %1806 = vmatprep.subr.mxu0 %v2033_v52 }
  0xc4   : > { %1807 = vmatpush3.msra.mxu0 %v2033_v52  ;;  %v631_v34 = vpop.permute.xlu0 %630 }
  0xc5   : > { %1809 = vmatmul.mubr.msk.f32.vlgmr.msra.gmra.mxu0 %vm673_vm0, %v562_v53  ;;  %v626_v36 = vpop.permute.xlu1 %625 }
  0xc6   : > { %1811 = vmatprep.mubr.msk.f32.mxu0 %vm673_vm0, %v563_v54 }
  0xc8   : > { %v621_v39 = vpop.permute.xlu0 %620 }
  0xc9   : > { %1812 = vmatmul.mubr.msk.f32.gmra.mxu0 %vm673_vm0, %v564_v55  ;;  %v616_v42 = vpop.permute.xlu1 %615 }
  0xca   : > { %1814 = vmatprep.mubr.msk.f32.mxu0 %vm673_vm0, %v565_v56 }
  0xcc   : > { %v611_v47 = vpop.permute.xlu0 %610 }
  0xcd   : > { %1815 = vmatmul.mubr.msk.f32.gmra.mxu0 %vm673_vm0, %v566_v57  ;;  %v606_v50 = vpop.permute.xlu1 %605 }
  0xce   : > { %1817 = vmatprep.mubr.msk.f32.mxu0 %vm673_vm0, %v567_v58 }
  0xd0   : > { %v601_v55 = vpop.permute.xlu0 %600 }
  0xd1   : > { %1818 = vmatmul.mubr.msk.f32.gmra.mxu0 %vm673_vm0, %v568_v59  ;;  %v596_v58 = vpop.permute.xlu1 %595 }
  0xd2   : > { %1820 = vmatprep.mubr.msk.f32.mxu0 %vm673_vm0, %v569_v60 }
  0xd5   : > { %1821 = vmatmul.mubr.msk.f32.gmra.mxu0 %vm673_vm0, %v570_v61 }
  0xd6   : > { %1823 = vmatprep.mubr.msk.f32.mxu0 %vm673_vm0, %v571_v62 }
  0xd9   : > { %1824 = vmatmul.mubr.msk.f32.gmra.mxu0 %vm673_vm0, %v572_v63 }
  0xda   : > { %1826 = vmatprep.mubr.msk.f32.mxu0 %vm673_vm0, %v573_v0 }
  0xdd   : > { %1827 = vmatmul.mubr.msk.f32.gmra.mxu0 %vm673_vm0, %v574_v1 }
  0xde   : > { %1829 = vmatprep.mubr.msk.f32.mxu0 %vm673_vm0, %v575_v2 }
  0xe1   : > { %1830 = vmatmul.mubr.msk.f32.gmra.mxu0 %vm673_vm0, %v576_v3 }
 0x185   : > { %v2603_v5 = vpop.f32.mrf.mxu0 }
 0x186   : > { %v794_v56 = vadd.f32 %v2603_v5, %v601_v55  ;;  %v884_v5 = vld [vmem:[%s2761_s5 + $0x8] sm:$0xff] }
 0x187   : > { %v2605_v6 = vpop.f32.mrf.mxu0 }
 0x188   : > { %v789_v59 = vadd.f32 %v2605_v6, %v596_v58  ;;  %v885_v6 = vld [vmem:[%s2761_s5 + $0x10] sm:$0xff] }
 0x189   : > { %v1813_v7 = vpop.f32.mrf.mxu0 }
 0x18a   : > { %v804_v51 = vadd.f32 %v1813_v7, %v611_v47  ;;  %v886_v7 = vld [vmem:[%s2761_s5 + $0x18] sm:$0xff] }
 0x18b   : > { %v2607_v8 = vpop.f32.mrf.mxu0 }
 0x18c   : > { %v799_v53 = vadd.f32 %v2607_v8, %v606_v50  ;;  %v887_v8 = vld [vmem:[%s2761_s5 + $0x20] sm:$0xff] }
 0x18d   : > { %v1816_v9 = vpop.f32.mrf.mxu0 }
 0x18e   : > { %v814_v45 = vadd.f32 %v1816_v9, %v621_v39  ;;  %v888_v9 = vld [vmem:[%s2761_s5 + $0x28] sm:$0xff] }
 0x18f   : > { %v808_v10 = vpop.f32.mrf.mxu0 }
 0x190   : > { %v809_v48 = vadd.f32 %v808_v10, %v616_v42  ;;  %v889_v10 = vld [vmem:[%s2761_s5 + $0x30] sm:$0xff] }
 0x191   : > { %v1819_v12 = vpop.f32.mrf.mxu0 }
 0x192   : > { %v824_v40 = vadd.f32 %v1819_v12, %v631_v34  ;;  %v891_v12 = vld [vmem:[%s2761_s5 + $0x40] sm:$0xff] }
 0x193   : > { %v818_v14 = vpop.f32.mrf.mxu0 }
 0x194   : > { %v819_v43 = vadd.f32 %v818_v14, %v626_v36  ;;  %v893_v14 = vld [vmem:[%s2761_s5 + $0x50] sm:$0xff] }
 0x195   : > { %v1822_v15 = vpop.f32.mrf.mxu0 }
 0x196   : > { %v834_v37 = vadd.f32 %v1822_v15, %v641_v27  ;;  %v894_v15 = vld [vmem:[%s2761_s5 + $0x58] sm:$0xff]  ;;  %v993_v27 = vpop.permute.xlu0 %992 }
 0x197   : > { %v828_v17 = vpop.f32.mrf.mxu0 }
 0x198   : > { %v829_v38 = vadd.f32 %v828_v17, %v636_v31  ;;  %v896_v17 = vld [vmem:[%s2761_s5 + $0x68] sm:$0xff] }
 0x199   : > { %v1825_v19 = vpop.f32.mrf.mxu0 }
 0x19a   : > { %v844_v33 = vadd.f32 %v1825_v19, %v651_v21  ;;  %v898_v19 = vld [vmem:[%s2761_s5 + $0x78] sm:$0xff] }
 0x19b   : > { %v838_v20 = vpop.f32.mrf.mxu0 }
 0x19c   : > { %v839_v35 = vadd.f32 %v838_v20, %v646_v23  ;;  %v1156_v20 = vld [vmem:[%s2763_s7] sm:$0xff] }
 0x19d   : > { %v1828_v22 = vpop.f32.mrf.mxu0  ;;  %1920 = vmatprep.mubr.f32.mxu0 %v1156_v20 }
 0x19e   : > { %v854_v29 = vadd.f32 %v1828_v22, %v661_v16  ;;  %v895_v16 = vld [vmem:[%s2761_s5 + $0x60] sm:$0xff] }
 0x19f   : > { %v848_v24 = vpop.f32.mrf.mxu0 }
 0x1a0   : > { %v849_v32 = vadd.f32 %v848_v24, %v656_v18  ;;  %v897_v18 = vld [vmem:[%s2761_s5 + $0x70] sm:$0xff] }
 0x1a1   : > { %v1831_v25 = vpop.f32.mrf.mxu0 }
 0x1a2   : > { %v864_v26 = vadd.f32 %v1831_v25, %v671_v11  ;;  %v890_v11 = vld [vmem:[%s2761_s5 + $0x38] sm:$0xff] }
 0x1a3   : > { %v858_v28 = vpop.f32.mrf.mxu0 }
 0x1a4   : > { %2034 = vtanh.f32 %v864_v26  ;;  %v859_v30 = vadd.f32 %v858_v28, %v666_v13  ;;  %v892_v13 = vld [vmem:[%s2761_s5 + $0x48] sm:$0xff] }
 0x1a6   : > { %2036 = vtanh.f32 %v859_v30 }
 0x1a7   : > { %2038 = vtanh.f32 %v854_v29  ;;  %v988_v29 = vpop.permute.xlu1 %987 }
 0x1a8   : > { %2040 = vtanh.f32 %v849_v32  ;;  %v983_v32 = vpop.permute.xlu0 %982 }
 0x1a9   : > { %2042 = vtanh.f32 %v844_v33 }
 0x1aa   : > { %2044 = vtanh.f32 %v839_v35 }
 0x1ab   : > { %2046 = vtanh.f32 %v834_v37  ;;  %v978_v34 = vpop.permute.xlu1 %977 }
 0x1ac   : > { %2048 = vtanh.f32 %v829_v38  ;;  %v973_v37 = vpop.permute.xlu0 %972 }
 0x1ad   : > { %2050 = vtanh.f32 %v824_v40 }
 0x1ae   : > { %2052 = vtanh.f32 %v819_v43 }
 0x1af   : > { %2054 = vtanh.f32 %v814_v45  ;;  %v968_v39 = vpop.permute.xlu1 %967 }
 0x1b0   : > { %2056 = vtanh.f32 %v809_v48  ;;  %v963_v43 = vpop.permute.xlu0 %962 }
 0x1b1   : > { %v2035_v41 = vpop.eup %2034  ;;  %2058 = vtanh.f32 %v804_v51 }
 0x1b2   : > { %1832 = vmatprep.subr.mxu1 %v2035_v41  ;;  %2060 = vtanh.f32 %v799_v53 }
 0x1b3   : > { %v2037_v44 = vpop.eup %2036  ;;  %1833 = vmatpush3.msra.mxu1 %v2035_v41  ;;  %2062 = vtanh.f32 %v794_v56  ;;  %v958_v47 = vpop.permute.xlu1 %957 }
 0x1b4   : > { %1834 = vmatprep.subr.mxu1 %v2037_v44  ;;  %v2039_v46 = vpop.eup %2038  ;;  %2064 = vtanh.f32 %v789_v59  ;;  %v953_v50 = vpop.permute.xlu0 %952 }
 0x1b5   : > { %1835 = vmatpush3.msra.mxu1 %v2037_v44  ;;  %v2041_v49 = vpop.eup %2040 }
 0x1b6   : > { %1836 = vmatprep.subr.mxu1 %v2039_v46  ;;  %v2043_v52 = vpop.eup %2042 }
 0x1b7   : > { %1837 = vmatpush3.msra.mxu1 %v2039_v46  ;;  %v2045_v54 = vpop.eup %2044 }
 0x1b8   : > { %1838 = vmatprep.subr.mxu1 %v2041_v49  ;;  %v2047_v57 = vpop.eup %2046  ;;  %v943_v55 = vpop.permute.xlu0 %942 }
 0x1b9   : > { %1839 = vmatpush3.msra.mxu1 %v2041_v49  ;;  %v2049_v60 = vpop.eup %2048 }
 0x1ba   : > { %1840 = vmatprep.subr.mxu1 %v2043_v52  ;;  %v2051_v61 = vpop.eup %2050 }
 0x1bb   : > { %1841 = vmatpush3.msra.mxu1 %v2043_v52  ;;  %v2053_v62 = vpop.eup %2052  ;;  %v948_v52 = vpop.permute.xlu1 %947 }
 0x1bc   : > { %1842 = vmatprep.subr.mxu1 %v2045_v54  ;;  %v2055_v63 = vpop.eup %2054 }
 0x1bd   : > { %1843 = vmatpush3.msra.mxu1 %v2045_v54  ;;  %v2057_v0 = vpop.eup %2056 }
 0x1be   : > { %1844 = vmatprep.subr.mxu1 %v2047_v57  ;;  %v2059_v1 = vpop.eup %2058 }
 0x1bf   : > { %1845 = vmatpush3.msra.mxu1 %v2047_v57  ;;  %v2061_v2 = vpop.eup %2060  ;;  %v938_v58 = vpop.permute.xlu1 %937 }
 0x1c0   : > { %1846 = vmatprep.subr.mxu1 %v2049_v60  ;;  %v2063_v3 = vpop.eup %2062 }
 0x1c1   : > { %1847 = vmatpush3.msra.mxu1 %v2049_v60  ;;  %v2065_v4 = vpop.eup %2064 }
 0x1c2   : > { %1848 = vmatprep.subr.mxu1 %v2051_v61 }
 0x1c3   : > { %1849 = vmatpush3.msra.mxu1 %v2051_v61 }
 0x1c4   : > { %1850 = vmatprep.subr.mxu1 %v2053_v62 }
 0x1c5   : > { %1851 = vmatpush3.msra.mxu1 %v2053_v62 }
 0x1c6   : > { %1852 = vmatprep.subr.mxu1 %v2055_v63 }
 0x1c7   : > { %1853 = vmatpush3.msra.mxu1 %v2055_v63  ;;  %v933_v63 = vpop.permute.xlu0 %932 }
 0x1c8   : > { %1854 = vmatprep.subr.mxu1 %v2057_v0 }
 0x1c9   : > { %1855 = vmatpush3.msra.mxu1 %v2057_v0 }
 0x1ca   : > { %1856 = vmatprep.subr.mxu1 %v2059_v1 }
 0x1cb   : > { %1857 = vmatpush3.msra.mxu1 %v2059_v1 }
 0x1cc   : > { %1858 = vmatprep.subr.mxu1 %v2061_v2 }
 0x1cd   : > { %1859 = vmatpush3.msra.mxu1 %v2061_v2  ;;  %v928_v2 = vpop.permute.xlu1 %927 }
 0x1ce   : > { %1860 = vmatprep.subr.mxu1 %v2063_v3 }
 0x1cf   : > { %1861 = vmatpush3.msra.mxu1 %v2063_v3 }
 0x1d0   : > { %1862 = vmatprep.subr.mxu1 %v2065_v4 }
 0x1d1   : > { %1863 = vmatpush3.msra.mxu1 %v2065_v4 }
 0x1d2   : > { %1865 = vmatmul.mubr.f32.vlgmr.msra.gmra.mxu1 %v884_v5 }
 0x1d3   : > { %1867 = vmatprep.mubr.f32.mxu1 %v885_v6 }
 0x1d6   : > { %1868 = vmatmul.mubr.f32.gmra.mxu1 %v886_v7  ;;  %v923_v7 = vpop.permute.xlu0 %922 }
 0x1d7   : > { %1870 = vmatprep.mubr.f32.mxu1 %v887_v8 }
 0x1da   : > { %1871 = vmatmul.mubr.f32.gmra.mxu1 %v888_v9 }
 0x1db   : > { %1873 = vmatprep.mubr.f32.mxu1 %v889_v10  ;;  %v918_v10 = vpop.permute.xlu1 %917 }
 0x1de   : > { %1874 = vmatmul.mubr.f32.gmra.mxu1 %v890_v11 }
 0x1df   : > { %1876 = vmatprep.mubr.f32.mxu1 %v891_v12 }
 0x1e2   : > { %1877 = vmatmul.mubr.f32.gmra.mxu1 %v892_v13 }
 0x1e3   : > { %1879 = vmatprep.mubr.f32.mxu1 %v893_v14 }
 0x1e6   : > { %1880 = vmatmul.mubr.f32.gmra.mxu1 %v894_v15 }
 0x1e7   : > { %1882 = vmatprep.mubr.f32.mxu1 %v895_v16 }
 0x1ea   : > { %1883 = vmatmul.mubr.f32.gmra.mxu1 %v896_v17 }
 0x1eb   : > { %1885 = vmatprep.mubr.f32.mxu1 %v897_v18 }
 0x1ee   : > { %1886 = vmatmul.mubr.f32.gmra.mxu1 %v898_v19 }
 0x292   : > { %v2660_v21 = vpop.f32.mrf.mxu1 }
 0x293   : > { %v1067_v8 = vadd.f32 %v2660_v21, %v923_v7  ;;  %v1157_v21 = vld [vmem:[%s2763_s7 + $0x8] sm:$0xff] }
 0x294   : > { %v2662_v22 = vpop.f32.mrf.mxu1 }
 0x295   : > { %v1062_v11 = vadd.f32 %v2662_v22, %v918_v10  ;;  %v1158_v22 = vld [vmem:[%s2763_s7 + $0x10] sm:$0xff] }
 0x296   : > { %v1869_v23 = vpop.f32.mrf.mxu1 }
 0x297   : > { %v1077_v3 = vadd.f32 %v1869_v23, %v933_v63  ;;  %v1159_v23 = vld [vmem:[%s2763_s7 + $0x18] sm:$0xff]  ;;  %v1330_v63 = vld [vmem:[%s2765_s9 + $0x28] sm:$0xff] }
 0x298   : > { %v2664_v24 = vpop.f32.mrf.mxu1 }
 0x299   : > { %v1072_v5 = vadd.f32 %v2664_v24, %v928_v2  ;;  %v1160_v24 = vld [vmem:[%s2763_s7 + $0x20] sm:$0xff]  ;;  %v1328_v2 = vld [vmem:[%s2765_s9 + $0x18] sm:$0xff] }
 0x29a   : > { %v1872_v25 = vpop.f32.mrf.mxu1 }
 0x29b   : > { %v1087_v61 = vadd.f32 %v1872_v25, %v943_v55  ;;  %v1161_v25 = vld [vmem:[%s2763_s7 + $0x28] sm:$0xff] }
 0x29c   : > { %v1081_v26 = vpop.f32.mrf.mxu1 }
 0x29d   : > { %v1082_v0 = vadd.f32 %v1081_v26, %v938_v58  ;;  %v1162_v26 = vld [vmem:[%s2763_s7 + $0x30] sm:$0xff] }
 0x29e   : > { %v1875_v28 = vpop.f32.mrf.mxu1 }
 0x29f   : > { %v1097_v56 = vadd.f32 %v1875_v28, %v953_v50  ;;  %v1325_v28 = vld [vmem:[%s2765_s9] sm:$0xff] }
 0x2a0   : > { %v1091_v30 = vpop.f32.mrf.mxu1 }
 0x2a1   : > { %v1092_v59 = vadd.f32 %v1091_v30, %v948_v52 }
 0x2a2   : > { %v1878_v31 = vpop.f32.mrf.mxu1 }
 0x2a3   : > { %v1107_v53 = vadd.f32 %v1878_v31, %v963_v43 }
 0x2a4   : > { %v1101_v33 = vpop.f32.mrf.mxu1 }
 0x2a5   : > { %v1102_v54 = vadd.f32 %v1101_v33, %v958_v47 }
 0x2a6   : > { %v1881_v35 = vpop.f32.mrf.mxu1 }
 0x2a7   : > { %v1117_v49 = vadd.f32 %v1881_v35, %v973_v37 }
 0x2a8   : > { %v1111_v36 = vpop.f32.mrf.mxu1 }
 0x2a9   : > { %v1112_v51 = vadd.f32 %v1111_v36, %v968_v39 }
 0x2aa   : > { %v1884_v38 = vpop.f32.mrf.mxu1 }
 0x2ab   : > { %v1127_v45 = vadd.f32 %v1884_v38, %v983_v32  ;;  %v1210_v32 = vpop.permute.xlu0 %1209 }
 0x2ac   : > { %v1121_v40 = vpop.f32.mrf.mxu1 }
 0x2ad   : > { %v1122_v48 = vadd.f32 %v1121_v40, %v978_v34  ;;  %v1205_v34 = vpop.permute.xlu1 %1204 }
 0x2ae   : > { %v1887_v41 = vpop.f32.mrf.mxu1 }
 0x2af   : > { %v1137_v42 = vadd.f32 %v1887_v41, %v993_v27  ;;  %v1163_v27 = vld [vmem:[%s2763_s7 + $0x38] sm:$0xff]  ;;  %v1200_v37 = vpop.permute.xlu0 %1199 }
 0x2b0   : > { %v1131_v44 = vpop.f32.mrf.mxu1 }
 0x2b1   : > { %2066 = vtanh.f32 %v1137_v42  ;;  %v1132_v46 = vadd.f32 %v1131_v44, %v988_v29  ;;  %v1329_v29 = vld [vmem:[%s2765_s9 + $0x20] sm:$0xff]  ;;  %v1195_v39 = vpop.permute.xlu1 %1194 }
 0x2b2   : > { %1954 = vmatprep.mubr.msk.f32.mxu1 %vm673_vm0, %v1329_v29 }
 0x2b3   : > { %2068 = vtanh.f32 %v1132_v46 }
 0x2b4   : > { %2070 = vtanh.f32 %v1127_v45  ;;  %v1190_v45 = vpop.permute.xlu0 %1189 }
 0x2b5   : > { %2072 = vtanh.f32 %v1122_v48  ;;  %v1185_v47 = vpop.permute.xlu1 %1184 }
 0x2b6   : > { %2074 = vtanh.f32 %v1117_v49 }
 0x2b7   : > { %2076 = vtanh.f32 %v1112_v51 }
 0x2b8   : > { %2078 = vtanh.f32 %v1107_v53  ;;  %v1180_v50 = vpop.permute.xlu0 %1179 }
 0x2b9   : > { %2080 = vtanh.f32 %v1102_v54  ;;  %v1175_v52 = vpop.permute.xlu1 %1174 }
 0x2ba   : > { %2082 = vtanh.f32 %v1097_v56 }
 0x2bb   : > { %2084 = vtanh.f32 %v1092_v59 }
 0x2bc   : > { %2086 = vtanh.f32 %v1087_v61 }
 0x2bd   : > { %2088 = vtanh.f32 %v1082_v0  ;;  %v1327_v0 = vld [vmem:[%s2765_s9 + $0x10] sm:$0xff] }
 0x2be   : > { %v2067_v57 = vpop.eup %2066  ;;  %2090 = vtanh.f32 %v1077_v3  ;;  %v1332_v3 = vld [vmem:[%s2765_s9 + $0x38] sm:$0xff] }
 0x2bf   : > { %1888 = vmatprep.subr.mxu0 %v2067_v57  ;;  %2092 = vtanh.f32 %v1072_v5  ;;  %v1349_v5 = vpop.permute.xlu1 %1348 }
 0x2c0   : > { %v2069_v60 = vpop.eup %2068  ;;  %1889 = vmatpush3.msra.mxu0 %v2067_v57  ;;  %2094 = vtanh.f32 %v1067_v8 }
 0x2c1   : > { %1890 = vmatprep.subr.mxu0 %v2069_v60  ;;  %v2071_v62 = vpop.eup %2070  ;;  %2096 = vtanh.f32 %v1062_v11 }
 0x2c2   : > { %1891 = vmatpush3.msra.mxu0 %v2069_v60  ;;  %v2073_v1 = vpop.eup %2072 }
 0x2c3   : > { %1892 = vmatprep.subr.mxu0 %v2071_v62  ;;  %v2075_v4 = vpop.eup %2074  ;;  %v1359_v7 = vpop.permute.xlu1 %1358 }
 0x2c4   : > { %1893 = vmatpush3.msra.mxu0 %v2071_v62  ;;  %v2077_v6 = vpop.eup %2076  ;;  %v1326_v62 = vld [vmem:[%s2765_s9 + $0x8] sm:$0xff] }
 0x2c5   : > { %1894 = vmatprep.subr.mxu0 %v2073_v1  ;;  %v2079_v9 = vpop.eup %2078 }
 0x2c6   : > { %1895 = vmatpush3.msra.mxu0 %v2073_v1  ;;  %v2081_v12 = vpop.eup %2080  ;;  %v1331_v1 = vld [vmem:[%s2765_s9 + $0x30] sm:$0xff] }
 0x2c7   : > { %1896 = vmatprep.subr.mxu0 %v2075_v4  ;;  %v2083_v13 = vpop.eup %2082  ;;  %v1369_v11 = vpop.permute.xlu1 %1368 }
 0x2c8   : > { %1897 = vmatpush3.msra.mxu0 %v2075_v4  ;;  %v2085_v14 = vpop.eup %2084  ;;  %v1344_v4 = vpop.permute.xlu0 %1343 }
 0x2c9   : > { %1898 = vmatprep.subr.mxu0 %v2077_v6  ;;  %v2087_v15 = vpop.eup %2086 }
 0x2ca   : > { %1899 = vmatpush3.msra.mxu0 %v2077_v6  ;;  %v2089_v16 = vpop.eup %2088 }
 0x2cb   : > { %1900 = vmatprep.subr.mxu0 %v2079_v9  ;;  %v2091_v17 = vpop.eup %2090 }
 0x2cc   : > { %1901 = vmatpush3.msra.mxu0 %v2079_v9  ;;  %v2093_v18 = vpop.eup %2092  ;;  %v1354_v6 = vpop.permute.xlu0 %1353 }
 0x2cd   : > { %1902 = vmatprep.subr.mxu0 %v2081_v12  ;;  %v2095_v19 = vpop.eup %2094 }
 0x2ce   : > { %1903 = vmatpush3.msra.mxu0 %v2081_v12  ;;  %v2097_v20 = vpop.eup %2096 }
 0x2cf   : > { %1904 = vmatprep.subr.mxu0 %v2083_v13 }
 0x2d0   : > { %1905 = vmatpush3.msra.mxu0 %v2083_v13  ;;  %v1364_v8 = vpop.permute.xlu0 %1363 }
 0x2d1   : > { %1906 = vmatprep.subr.mxu0 %v2085_v14 }
 0x2d2   : > { %1907 = vmatpush3.msra.mxu0 %v2085_v14 }
 0x2d3   : > { %1908 = vmatprep.subr.mxu0 %v2087_v15 }
 0x2d4   : > { %1909 = vmatpush3.msra.mxu0 %v2087_v15 }
 0x2d5   : > { %1910 = vmatprep.subr.mxu0 %v2089_v16 }
 0x2d6   : > { %1911 = vmatpush3.msra.mxu0 %v2089_v16 }
 0x2d7   : > { %1912 = vmatprep.subr.mxu0 %v2091_v17 }
 0x2d8   : > { %1913 = vmatpush3.msra.mxu0 %v2091_v17 }
 0x2d9   : > { %1914 = vmatprep.subr.mxu0 %v2093_v18 }
 0x2da   : > { %1915 = vmatpush3.msra.mxu0 %v2093_v18 }
 0x2db   : > { %1916 = vmatprep.subr.mxu0 %v2095_v19 }
 0x2dc   : > { %1917 = vmatpush3.msra.mxu0 %v2095_v19  ;;  %v1374_v19 = vpop.permute.xlu0 %1373 }
 0x2dd   : > { %1918 = vmatprep.subr.mxu0 %v2097_v20 }
 0x2de   : > { %1919 = vmatpush3.msra.mxu0 %v2097_v20 }
 0x2df   : > { %1921 = vmatmul.mubr.f32.vlgmr.msra.gmra.mxu0 %v1157_v21 }
 0x2e0   : > { %1923 = vmatprep.mubr.f32.mxu0 %v1158_v22 }
 0x2e3   : > { %1924 = vmatmul.mubr.f32.gmra.mxu0 %v1159_v23  ;;  %v1379_v23 = vpop.permute.xlu1 %1378 }
 0x2e4   : > { %1926 = vmatprep.mubr.f32.mxu0 %v1160_v24 }
 0x2e7   : > { %1927 = vmatmul.mubr.f32.gmra.mxu0 %v1161_v25  ;;  %v1534_v29 = vpop.permute.xlu1 %1533 }
 0x2e8   : > { %1929 = vmatprep.mubr.f32.mxu0 %v1162_v26 }
 0x2eb   : > { %1930 = vmatmul.mubr.f32.gmra.mxu0 %v1163_v27  ;;  %v1529_v27 = vpop.permute.xlu0 %1528 }
 0x2ec   : > { %1948 = vmatprep.mubr.msk.f32.mxu0 %vm673_vm0, %v1325_v28 }
 0x39f   : > { %v1922_v30 = vpop.f32.mrf.mxu0 }
 0x3a0   : > { %v1284_v51 = vadd.f32 %v1922_v30, %v1180_v50 }
 0x3a1   : > { %v1278_v31 = vpop.f32.mrf.mxu0 }
 0x3a2   : > { %v1279_v53 = vadd.f32 %v1278_v31, %v1175_v52 }
 0x3a3   : > { %v1925_v33 = vpop.f32.mrf.mxu0 }
 0x3a4   : > { %v1294_v48 = vadd.f32 %v1925_v33, %v1190_v45 }
 0x3a5   : > { %v1288_v35 = vpop.f32.mrf.mxu0 }
 0x3a6   : > { %v1289_v49 = vadd.f32 %v1288_v35, %v1185_v47 }
 0x3a7   : > { %v1928_v36 = vpop.f32.mrf.mxu0 }
 0x3a8   : > { %v1304_v43 = vadd.f32 %v1928_v36, %v1200_v37 }
 0x3a9   : > { %v1298_v38 = vpop.f32.mrf.mxu0 }
 0x3aa   : > { %v1299_v46 = vadd.f32 %v1298_v38, %v1195_v39 }
 0x3ab   : > { %v1931_v40 = vpop.f32.mrf.mxu0 }
 0x3ac   : > { %v1314_v41 = vadd.f32 %v1931_v40, %v1210_v32  ;;  %v1539_v32 = vpop.permute.xlu0 %1538 }
 0x3ad   : > { %v1308_v42 = vpop.f32.mrf.mxu0 }
 0x3ae   : > { %2098 = vtanh.f32 %v1314_v41  ;;  %v1309_v44 = vadd.f32 %v1308_v42, %v1205_v34  ;;  %v1544_v34 = vpop.permute.xlu1 %1543 }
 0x3b0   : > { %2100 = vtanh.f32 %v1309_v44  ;;  %v1549_v41 = vpop.permute.xlu0 %1548 }
 0x3b1   : > { %2102 = vtanh.f32 %v1304_v43 }
 0x3b2   : > { %2104 = vtanh.f32 %v1299_v46  ;;  %v1554_v45 = vpop.permute.xlu1 %1553 }
 0x3b3   : > { %2106 = vtanh.f32 %v1294_v48 }
 0x3b4   : > { %2108 = vtanh.f32 %v1289_v49  ;;  %v1559_v52 = vpop.permute.xlu0 %1558 }
 0x3b5   : > { %2110 = vtanh.f32 %v1284_v51 }
 0x3b6   : > { %2112 = vtanh.f32 %v1279_v53 }
 0x3bb   : > { %v2099_v54 = vpop.eup %2098 }
 0x3bc   : > { %1932 = vmatprep.subr.mxu0 %v2099_v54  ;;  %1960 = vmatprep.subr.mxu1 %v2099_v54 }
 0x3bd   : > { %v2101_v55 = vpop.eup %2100  ;;  %1933 = vmatpush3.msra.mxu0 %v2099_v54  ;;  %1968 = vmatpush3.msra.mxu1 %v2099_v54 }
 0x3be   : > { %1934 = vmatprep.subr.mxu0 %v2101_v55  ;;  %1961 = vmatprep.subr.mxu1 %v2101_v55  ;;  %v2103_v56 = vpop.eup %2102 }
 0x3bf   : > { %1935 = vmatpush3.msra.mxu0 %v2101_v55  ;;  %1969 = vmatpush3.msra.mxu1 %v2101_v55  ;;  %v2105_v57 = vpop.eup %2104  ;;  %v1564_v55 = vpop.permute.xlu1 %1563 }
 0x3c0   : > { %1936 = vmatprep.subr.mxu0 %v2103_v56  ;;  %1962 = vmatprep.subr.mxu1 %v2103_v56  ;;  %v2107_v58 = vpop.eup %2106 }
 0x3c1   : > { %1937 = vmatpush3.msra.mxu0 %v2103_v56  ;;  %1970 = vmatpush3.msra.mxu1 %v2103_v56  ;;  %v2109_v59 = vpop.eup %2108 }
 0x3c2   : > { %1938 = vmatprep.subr.mxu0 %v2105_v57  ;;  %1963 = vmatprep.subr.mxu1 %v2105_v57  ;;  %v2111_v60 = vpop.eup %2110 }
 0x3c3   : > { %1939 = vmatpush3.msra.mxu0 %v2105_v57  ;;  %1971 = vmatpush3.msra.mxu1 %v2105_v57  ;;  %v2113_v61 = vpop.eup %2112 }
 0x3c4   : > { %1940 = vmatprep.subr.mxu0 %v2107_v58  ;;  %1964 = vmatprep.subr.mxu1 %v2107_v58 }
 0x3c5   : > { %1941 = vmatpush3.msra.mxu0 %v2107_v58  ;;  %1972 = vmatpush3.msra.mxu1 %v2107_v58  ;;  %v1593_v58 = vlaneseq }
 0x3c6   : > { %1942 = vmatprep.subr.mxu0 %v2109_v59  ;;  %1965 = vmatprep.subr.mxu1 %v2109_v59 }
 0x3c7   : > { %1943 = vmatpush3.msra.mxu0 %v2109_v59  ;;  %1973 = vmatpush3.msra.mxu1 %v2109_v59 }
 0x3c8   : > { %1944 = vmatprep.subr.mxu0 %v2111_v60  ;;  %1966 = vmatprep.subr.mxu1 %v2111_v60 }
 0x3c9   : > { %1945 = vmatpush3.msra.mxu0 %v2111_v60  ;;  %1974 = vmatpush3.msra.mxu1 %v2111_v60 }
 0x3ca   : > { %1946 = vmatprep.subr.mxu0 %v2113_v61  ;;  %1967 = vmatprep.subr.mxu1 %v2113_v61 }
 0x3cb   : > { %1947 = vmatpush3.msra.mxu0 %v2113_v61  ;;  %1975 = vmatpush3.msra.mxu1 %v2113_v61  ;;  %v1594_v61 = vshrl.u32 %v1593_v58, 7 }
 0x3cc   : > { %1949 = vmatmul.mubr.msk.f32.vlgmr.msra.gmra.mxu0 %vm673_vm0, %v1326_v62  ;;  %1955 = vmatmul.mubr.msk.f32.vlgmr.msra.gmra.mxu1 %vm673_vm0, %v1330_v63 }
 0x3cd   : > { %1951 = vmatprep.mubr.msk.f32.mxu0 %vm673_vm0, %v1327_v0  ;;  %1957 = vmatprep.mubr.msk.f32.mxu1 %vm673_vm0, %v1331_v1  ;;  %v1595_v0 = vsub.s32 0, %v1594_v61 }
 0x3d0   : > { %1952 = vmatmul.mubr.msk.f32.gmra.mxu0 %vm673_vm0, %v1328_v2  ;;  %1958 = vmatmul.mubr.msk.f32.gmra.mxu1 %vm673_vm0, %v1332_v3  ;;  %v1591_v2 = vpop.permute.xlu0 %1590 }
 0x48c   : > { %v1950_v9 = vpop.f32.mrf.mxu0  ;;  %v1956_v10 = vpop.f32.mrf.mxu1 }
 0x48d   : > { %v1477_v12 = vadd.f32 %v1950_v9, %v1349_v5  ;;  %v1497_v25 = vadd.f32 %v1956_v10, %v1369_v11 }
 0x48e   : > { %v1471_v13 = vpop.f32.mrf.mxu0  ;;  %v1491_v14 = vpop.f32.mrf.mxu1 }
 0x48f   : > { %v1472_v15 = vadd.f32 %v1471_v13, %v1344_v4  ;;  %2114 = vtanh.f32 %v1477_v12  ;;  %v1492_v21 = vadd.f32 %v1491_v14, %v1364_v8  ;;  %v1596_v4 = vrot.slane %v1591_v2, %v1595_v0 }
 0x490   : > { %v1953_v16 = vpop.f32.mrf.mxu0  ;;  %v1959_v17 = vpop.f32.mrf.mxu1 }
 0x491   : > { %2116 = vtanh.f32 %v1472_v15  ;;  %v1487_v18 = vadd.f32 %v1953_v16, %v1359_v7  ;;  %v1507_v28 = vadd.f32 %v1959_v17, %v1379_v23 }
 0x492   : > { %v1481_v20 = vpop.f32.mrf.mxu0  ;;  %v1501_v24 = vpop.f32.mrf.mxu1 }
 0x493   : > { %v1482_v22 = vadd.f32 %v1481_v20, %v1354_v6  ;;  %2118 = vtanh.f32 %v1487_v18  ;;  %v1502_v26 = vadd.f32 %v1501_v24, %v1374_v19 }
 0x495   : > { %2120 = vtanh.f32 %v1482_v22 }
 0x496   : > { %2122 = vtanh.f32 %v1492_v21 }
 0x497   : > { %2124 = vtanh.f32 %v1497_v25 }
 0x498   : > { %2126 = vtanh.f32 %v1502_v26 }
 0x499   : > { %2128 = vtanh.f32 %v1507_v28 }
 0x49c   : > { %v2115_v30 = vpop.eup %2114 }
 0x49d   : > { %v1567_v36 = vmul.f32 %v2115_v30, %v1534_v29 }
 0x49e   : > { %v2117_v31 = vpop.eup %2116 }
 0x49f   : > { %v1566_v33 = vmul.f32 %v2117_v31, %v1529_v27 }
 0x4a0   : > { %v2119_v35 = vpop.eup %2118 }
 0x4a1   : > { %v1574_v38 = vadd.f32 %v1567_v36, %v1566_v33  ;;  %v1569_v42 = vmul.f32 %v2119_v35, %v1544_v34 }
 0x4a2   : > { %v2121_v37 = vpop.eup %2120 }
 0x4a3   : > { %v1568_v39 = vmul.f32 %v2121_v37, %v1539_v32  ;;  %v2123_v40 = vpop.eup %2122 }
 0x4a4   : > { %v2125_v44 = vpop.eup %2124  ;;  %v1570_v46 = vmul.f32 %v2123_v40, %v1549_v41 }
 0x4a5   : > { %v1575_v43 = vadd.f32 %v1574_v38, %v1568_v39  ;;  %v2127_v48 = vpop.eup %2126  ;;  %v1571_v49 = vmul.f32 %v2125_v44, %v1554_v45 }
 0x4a6   : > { %v2129_v51 = vpop.eup %2128  ;;  %v1572_v53 = vmul.f32 %v2127_v48, %v1559_v52 }
 0x4a7   : > { %v1576_v47 = vadd.f32 %v1575_v43, %v1569_v42  ;;  %v1573_v56 = vmul.f32 %v2129_v51, %v1564_v55 }
 0x4a9   : > { %v1577_v50 = vadd.f32 %v1576_v47, %v1570_v46 }
 0x4ab   : > { %v1578_v54 = vadd.f32 %v1577_v50, %v1571_v49 }
 0x4ad   : > { %v1579_v57 = vadd.f32 %v1578_v54, %v1572_v53 }
 0x4af   : > { %v1580_v59 = vadd.f32 %v1579_v57, %v1573_v56 }
 0x4b1   : > { %v1581_v60 = vrot.slane %v1580_v59, 4 }
 0x4b3   : > { %v1582_v62 = vadd.f32 %v1581_v60, %v1580_v59 }
 0x4b5   : > { %v1583_v63 = vrot.slane %v1582_v62, 2 }
 0x4b7   : > { %v1584_v1 = vadd.f32 %v1583_v63, %v1582_v62 }
 0x4b9   : > { %v1585_v3 = vrot.slane %v1584_v1, 1 }
 0x4bb   : > { %v1586_v5 = vadd.f32 %v1585_v3, %v1584_v1 }
 0x4bd   : > { %v1597_v6 = vadd.f32 %v1596_v4, %v1586_v5 }
 0x4bf   : > { %1598 = vst [vmem:[%s430_s2] sm:$0x1] %v1597_v6 }
 0x4c0   : > { %2143 = shalt.err (!%p2140_p3)
}
 0x4c1   : > { %s2144_s25 = scalar_lea.hbm %s1610_s17, 16  ;;  %s2148_s2 = scalar_lea.hbm %s2769_s13, 48 }
 0x4c2   : > { %p2145_p4 = scmp.ne.s32.totalorder %s1610_s17, %s2144_s25  ;;  %p2149_p9 = scmp.lt.s32.totalorder %s1610_s17, %s2769_s13 }
 0x4c3   : > { %p2150_p10 = scmp.lt.s32.totalorder %s2148_s2, %s2144_s25 }
 0x4c4   : > { %p2146_p7 = pnand %p2145_p4, %p2305_p5 }
 0x4c5   : > { %p2151_p11 = por %p2150_p10, %p2149_p9 }
 0x4c6   : > { %p2147_p8 = pneg %p2146_p7 }
 0x4c8   : > { %p2152_p12 = pnand %p2151_p11, %p2147_p8 }
 0x4ca   : > { %2155 = shalt.err (!%p2152_p12)
}
 0x4cb   : > { %1976 = dma.vmem_to_hbm [thread:$0]  (%p2305_p5), %s1613_s26, 16, %s1610_s17, %s1600_s21  }
 0x4cc PF: > { %p1982_p13 = scmp.ge.s32.totalorder %s2190_s30, 2  ;;  %s1624_s22 = sand.u32 1, %s2178_s27  }
 0x4cd   : > { %s1625_s23 = scalar_lea.sflag [#allocation4], %s1624_s22 }
 0x4ce   : > { %p1979_p0 = pnand %p1982_p13, %p2309_p6 }
 0x4d0   : > { %p1980_p1 = pneg %p1979_p0 }
 0x4d2   : > { %2173 = dma.done.wait (%p1980_p1), %s1625_s23, 16  }
 0x4d3   : > { %2175 = vsyncadd (%p1980_p1), %s1625_s23, 4294967280  ;;  %s2777_s24 = sld [smem:[#allocation6_spill]]  ;;  %p25_p2 = scmp.ge.s32.totalorder %s2292_s15, 5  }
 0x4d4   : > { %s2778_s27 = smov %s2182_s28  ;;  %s2779_s28 = smov %s2186_s29 }
 0x4d5   : > { %s2781_s30 = smov %s2292_s15  ;;  %27 = sbr.rel (!%p25_p2) target bundleno = 6 (0x6), region = 107 }
 0x4d9   : > { %s2780_s29 = smov %s2777_s24 }
 0x4da   :  { %1629 = vsyncpa [#allocation4], 1 }
 0x4db   :  { %1631 = vsyncpa [#allocation4 + $0x1], 1 }

</bundles_post_ra>
